<compile_context>
chip_gen: v7x
topology: tpu7x:2x2x1
jax: 0.10.0
libtpu: 0.0.40
codegen_flags: <defaults>
</compile_context>

<pallas_src>
import functools
import math

import jax
import jax.numpy as jnp
from jax import lax
from jax.experimental import pallas as pl
from jax.experimental.pallas import tpu as pltpu

# Generation-neutral VMEM budget (v7x only has 64 MiB physical).
# TODO(synk): tune per generation (v6e can go 64-96 MiB, v5e scoped default is 16 MiB).
_VMEM_LIMIT = 48 * 1024 * 1024


# ------------------------------- helpers ----------------------------------- #

def _round_up(n, m):
    return ((n + m - 1) // m) * m


def _pick_tile(n, pref, align=8):
    """Largest divisor of n that is <= pref and a multiple of `align`; n if none."""
    if n <= pref:
        return n
    for cand in range(pref, align - 1, -1):
        if cand % align == 0 and n % cand == 0:
            return cand
    return n


def _deinterleave_perm(n_heads, head_dim):
    """Column permutation turning per-head interleaved (r0,i0,r1,i1,...) features into
    contiguous [r0..r_{h/2-1} | i0..i_{h/2-1}] halves (torch.view_as_complex pairing)."""
    half = head_dim // 2
    idx = []
    for h in range(n_heads):
        base = h * head_dim
        idx.extend(base + 2 * j for j in range(half))
        idx.extend(base + 2 * j + 1 for j in range(half))
    return jnp.asarray(idx, dtype=jnp.int32)


def prepare_attention_params(params, n_heads, n_kv_heads, head_dim):
    """One-time (checkpoint-load-time) weight prep: permute wq/wk columns into the
    per-head [real | imag] layout the fused QKV+RoPE kernel expects.  Hoisted out of
    the forward path so no HBM-sized gather happens per call."""
    return {
        "wq": params["wq"][:, _deinterleave_perm(n_heads, head_dim)],
        "wk": params["wk"][:, _deinterleave_perm(n_kv_heads, head_dim)],
        "wv": params["wv"],
        "wo": params["wo"],
    }


# ----------------------------- Pallas kernels ------------------------------ #

def _rope_apply(acc, cosw, sgnw, head_dim):
    """Lane-dense RoPE on a (tm, n_heads*head_dim) f32 slab whose per-head columns are
    laid out as [re(half) | im(half)].  cosw / sgnw are full-width tables with per-head
    pattern [cos|cos] / [-sin|sin].  Two full-slab rolls + selects: no per-head pieces,
    no concatenate of sub-128-lane slices, full-width stores by the caller."""
    half = head_dim // 2
    col = lax.broadcasted_iota(jnp.int32, acc.shape, 1)
    is_re = (col % head_dim) < half
    partner = jnp.where(is_re,
                        jnp.roll(acc, -half, axis=-1),   # re columns pick up their im
                        jnp.roll(acc, half, axis=-1))    # im columns pick up their re
    return acc * cosw + partner * sgnw


def _qkv_rope_kernel(x_ref, wq_ref, wk_ref, wv_ref, cos2_ref, msin_ref,
                     q_ref, k_ref, v_ref, accq_ref, acck_ref, accv_ref,
                     *, n_heads_q, n_kv_heads, head_dim, q_scale):
    k_step = pl.program_id(1)

    @pl.when(k_step == 0)
    def _init():
        accq_ref[...] = jnp.zeros_like(accq_ref)
        acck_ref[...] = jnp.zeros_like(acck_ref)
        accv_ref[...] = jnp.zeros_like(accv_ref)

    x = x_ref[...]                                   # read the x tile once for all three
    accq_ref[...] += jnp.dot(x, wq_ref[...], preferred_element_type=jnp.float32)
    acck_ref[...] += jnp.dot(x, wk_ref[...], preferred_element_type=jnp.float32)
    accv_ref[...] += jnp.dot(x, wv_ref[...], preferred_element_type=jnp.float32)

    @pl.when(k_step == pl.num_programs(1) - 1)
    def _finalize():
        cos2 = cos2_ref[...]                          # (tm, D) = [cos | cos], f32
        msin = msin_ref[...]                          # (tm, D) = [-sin | sin], f32
        # Tile to full projection width (lane-aligned vreg copies at D == 128).
        cosw_k = jnp.concatenate([cos2] * n_kv_heads, axis=-1)
        sgnw_k = jnp.concatenate([msin] * n_kv_heads, axis=-1)
        # Fold the 1/sqrt(head_dim) attention scale into the Q tables (free).
        cosw_q = jnp.concatenate([cos2 * q_scale] * n_heads_q, axis=-1)
        sgnw_q = jnp.concatenate([msin * q_scale] * n_heads_q, axis=-1)
        q_ref[...] = _rope_apply(accq_ref[...], cosw_q, sgnw_q, head_dim).astype(q_ref.dtype)
        k_ref[...] = _rope_apply(acck_ref[...], cosw_k, sgnw_k, head_dim).astype(k_ref.dtype)
        v_ref[...] = accv_ref[...].astype(v_ref.dtype)


def _flash_attn_kernel(q_ref, k_ref, v_ref, o_ref, m_ref, l_ref, acc_ref,
                       *, kv_len, kv_tile, needs_mask):
    t = pl.program_id(3)

    @pl.when(t == 0)
    def _init():
        m_ref[...] = jnp.full_like(m_ref, -jnp.inf)
        l_ref[...] = jnp.zeros_like(l_ref)
        acc_ref[...] = jnp.zeros_like(acc_ref)

    q = q_ref[0, 0]                                  # (tq, D); already scaled by 1/sqrt(D)
    k = k_ref[0, 0]                                  # (tk, D)
    v = v_ref[0, 0]

    # Contract the last dims of q and k directly (no k.T / XLU transpose).
    s = lax.dot_general(q, k, (((1,), (1,)), ((), ())),
                        preferred_element_type=jnp.float32)          # (tq, tk)
    if needs_mask:
        col = t * kv_tile + lax.broadcasted_iota(jnp.int32, s.shape, 1)
        s = jnp.where(col < kv_len, s, -jnp.inf)

    m_prev = m_ref[:, :1]
    m_new = jnp.maximum(m_prev, jnp.max(s, axis=-1, keepdims=True))
    alpha = jnp.exp(m_prev - m_new)
    p = jnp.exp(s - m_new)
    l_new = alpha * l_ref[:, :1] + jnp.sum(p, axis=-1, keepdims=True)
    acc_ref[...] = alpha * acc_ref[...] + jnp.dot(
        p.astype(v.dtype), v, preferred_element_type=jnp.float32)
    # Lane-dense scratch stores (no 1-lane masked vst).
    m_ref[...] = jnp.broadcast_to(m_new, m_ref.shape)
    l_ref[...] = jnp.broadcast_to(l_new, l_ref.shape)

    @pl.when(t == pl.num_programs(3) - 1)
    def _finalize():
        l = l_ref[:, :1]
        inv = pl.reciprocal(l, approx=True)          # EUP slot
        inv = inv * (2.0 - l * inv)                  # one Newton step keeps f32 accuracy
        o_ref[0, 0] = (acc_ref[...] * inv).astype(o_ref.dtype)


def _kv_cache_update_kernel(xk_ref, xv_ref, ck_in_ref, cv_in_ref,
                            ck_out_ref, cv_out_ref, sem, *, start_pos):
    # The cache outputs are aliased to the cache inputs (same HBM buffers): only the S
    # new rows per (batch, kv-head) are DMA'd; the rest of the cache is untouched.
    del ck_in_ref, cv_in_ref
    b = pl.program_id(0)
    h = pl.program_id(1)
    s_len = xk_ref.shape[2]
    ck_copy = pltpu.make_async_copy(
        xk_ref.at[0, 0], ck_out_ref.at[b, h, pl.ds(start_pos, s_len)], sem.at[0])
    cv_copy = pltpu.make_async_copy(
        xv_ref.at[0, 0], cv_out_ref.at[b, h, pl.ds(start_pos, s_len)], sem.at[1])
    ck_copy.start()
    cv_copy.start()
    ck_copy.wait()
    cv_copy.wait()


def _matmul_kernel(x_ref, w_ref, o_ref, acc_ref):
    @pl.when(pl.program_id(2) == 0)
    def _init():
        acc_ref[...] = jnp.zeros_like(acc_ref)

    acc_ref[...] += jnp.dot(x_ref[...], w_ref[...], preferred_element_type=jnp.float32)

    @pl.when(pl.program_id(2) == pl.num_programs(2) - 1)
    def _finalize():
        o_ref[...] = acc_ref[...].astype(o_ref.dtype)


# ----------------------------- kernel wrappers ------------------------------ #

def qkv_rope_pallas(x2d, wq, wk, wv, cos2_rows, msin_rows,
                    n_heads_q, n_kv_heads, head_dim, *, tm_pref=256, tk_pref=512):
    M, K = x2d.shape
    Nq = wq.shape[1]
    Nk = wk.shape[1]
    D = head_dim
    tm = _pick_tile(M, tm_pref)
    tk = _pick_tile(K, tk_pref)
    grid = (M // tm, K // tk)
    q_scale = 1.0 / math.sqrt(D)

    itemsize = x2d.dtype.itemsize
    cost = pl.CostEstimate(
        flops=int(2 * M * K * (Nq + 2 * Nk) + 8 * M * (Nq + Nk)),
        transcendentals=0,
        bytes_accessed=int(itemsize * (M * K + K * (Nq + 2 * Nk) + M * (Nq + 2 * Nk))
                           + 4 * 2 * M * D))

    # TODO(synk): for v7x at production dims add an output-column (head-group) grid axis
    # so the Q accumulator is (tm, Nq_tile) rather than full Nq width.
    kernel = functools.partial(_qkv_rope_kernel, n_heads_q=n_heads_q,
                               n_kv_heads=n_kv_heads, head_dim=D, q_scale=q_scale)
    return pl.pallas_call(
        kernel,
        out_shape=(jax.ShapeDtypeStruct((M, Nq), x2d.dtype),
                   jax.ShapeDtypeStruct((M, Nk), x2d.dtype),
                   jax.ShapeDtypeStruct((M, Nk), x2d.dtype)),
        grid=grid,
        in_specs=[
            pl.BlockSpec((tm, tk), lambda i, k: (i, k)),
            pl.BlockSpec((tk, Nq), lambda i, k: (k, 0)),
            pl.BlockSpec((tk, Nk), lambda i, k: (k, 0)),
            pl.BlockSpec((tk, Nk), lambda i, k: (k, 0)),
            pl.BlockSpec((tm, D), lambda i, k: (i, 0)),
            pl.BlockSpec((tm, D), lambda i, k: (i, 0)),
        ],
        out_specs=(
            pl.BlockSpec((tm, Nq), lambda i, k: (i, 0)),
            pl.BlockSpec((tm, Nk), lambda i, k: (i, 0)),
            pl.BlockSpec((tm, Nk), lambda i, k: (i, 0)),
        ),
        scratch_shapes=[
            pltpu.VMEM((tm, Nq), jnp.float32),
            pltpu.VMEM((tm, Nk), jnp.float32),
            pltpu.VMEM((tm, Nk), jnp.float32),
        ],
        compiler_params=pltpu.CompilerParams(
            dimension_semantics=("parallel", "arbitrary"),
            vmem_limit_bytes=_VMEM_LIMIT),
        cost_estimate=cost,
    )(x2d, wq, wk, wv, cos2_rows, msin_rows)


def flash_attention_pallas(q, k_cache, v_cache, *, kv_len, batch,
                           tq_pref=256, kv_tile_pref=512):
    """q: (B, G, R, D) pre-scaled query rows per kv group (R = n_rep * S).
    k_cache/v_cache: (max_batch, G, max_seq, D); only rows < kv_len are attended."""
    B = batch
    _, G, R, D = q.shape
    max_seq = k_cache.shape[2]
    tq = _pick_tile(R, tq_pref)
    tk = min(kv_tile_pref, min(max_seq, _round_up(kv_len, 8)))
    nkv = pl.cdiv(kv_len, tk)
    needs_mask = (kv_len % tk) != 0
    grid = (B, G, R // tq, nkv)

    itemsize = q.dtype.itemsize
    cost = pl.CostEstimate(
        flops=int(4 * B * G * R * kv_len * D),
        transcendentals=int(B * G * R * nkv * tk),
        bytes_accessed=int(itemsize * (2 * B * G * R * D + 2 * B * G * nkv * tk * D)))

    # TODO(synk): decode (R == n_rep) restructuring: block several KV-head groups per grid
    # step (or swap matmul operands) so the 256x256 MXU is not starved at tiny R.
    kernel = functools.partial(_flash_attn_kernel, kv_len=kv_len, kv_tile=tk,
                               needs_mask=needs_mask)
    return pl.pallas_call(
        kernel,
        out_shape=jax.ShapeDtypeStruct((B, G, R, D), q.dtype),
        grid=grid,
        in_specs=[
            pl.BlockSpec((1, 1, tq, D), lambda b, g, qi, ti: (b, g, qi, 0)),
            pl.BlockSpec((1, 1, tk, D), lambda b, g, qi, ti: (b, g, ti, 0)),
            pl.BlockSpec((1, 1, tk, D), lambda b, g, qi, ti: (b, g, ti, 0)),
        ],
        out_specs=pl.BlockSpec((1, 1, tq, D), lambda b, g, qi, ti: (b, g, qi, 0)),
        scratch_shapes=[
            pltpu.VMEM((tq, 128), jnp.float32),   # running max (lane-dense)
            pltpu.VMEM((tq, 128), jnp.float32),   # running sum (lane-dense)
            pltpu.VMEM((tq, D), jnp.float32),     # output accumulator
        ],
        compiler_params=pltpu.CompilerParams(
            dimension_semantics=("parallel", "parallel", "parallel", "arbitrary"),
            vmem_limit_bytes=_VMEM_LIMIT),
        cost_estimate=cost,
    )(q, k_cache, v_cache)


def kv_cache_update_pallas(xk_t, xv_t, cache_k, cache_v, start_pos):
    """In-place-style KV-cache writeback: only the S new rows at start_pos are written.
    xk_t/xv_t: (B, Hkv, S, D); caches: (max_batch, Hkv, max_seq, D)."""
    B, Hkv, S, D = xk_t.shape
    kernel = functools.partial(_kv_cache_update_kernel, start_pos=start_pos)
    return pl.pallas_call(
        kernel,
        out_shape=(jax.ShapeDtypeStruct(cache_k.shape, cache_k.dtype),
                   jax.ShapeDtypeStruct(cache_v.shape, cache_v.dtype)),
        grid=(B, Hkv),
        in_specs=[
            pl.BlockSpec((1, 1, S, D), lambda b, h: (b, h, 0, 0)),
            pl.BlockSpec((1, 1, S, D), lambda b, h: (b, h, 0, 0)),
            pl.BlockSpec(memory_space=pl.ANY),
            pl.BlockSpec(memory_space=pl.ANY),
        ],
        out_specs=(pl.BlockSpec(memory_space=pl.ANY),
                   pl.BlockSpec(memory_space=pl.ANY)),
        scratch_shapes=[pltpu.SemaphoreType.DMA((2,))],
        input_output_aliases={2: 0, 3: 1},
        compiler_params=pltpu.CompilerParams(
            dimension_semantics=("arbitrary", "arbitrary")),
    )(xk_t, xv_t, cache_k, cache_v)


def matmul_pallas(x2d, w, *, tm_pref=256, tn_pref=256, tk_pref=512):
    M, K = x2d.shape
    K2, N = w.shape
    assert K == K2
    tm = _pick_tile(M, tm_pref)
    tn = _pick_tile(N, tn_pref)
    tk = _pick_tile(K, tk_pref)
    grid = (M // tm, N // tn, K // tk)

    itemsize = x2d.dtype.itemsize
    cost = pl.CostEstimate(
        flops=int(2 * M * K * N), transcendentals=0,
        bytes_accessed=int(itemsize * (M * K + K * N + M * N)))

    return pl.pallas_call(
        _matmul_kernel,
        out_shape=jax.ShapeDtypeStruct((M, N), x2d.dtype),
        grid=grid,
        in_specs=[
            pl.BlockSpec((tm, tk), lambda i, j, kk: (i, kk)),
            pl.BlockSpec((tk, tn), lambda i, j, kk: (kk, j)),
        ],
        out_specs=pl.BlockSpec((tm, tn), lambda i, j, kk: (i, j)),
        scratch_shapes=[pltpu.VMEM((tm, tn), jnp.float32)],
        compiler_params=pltpu.CompilerParams(
            dimension_semantics=("parallel", "parallel", "arbitrary"),
            vmem_limit_bytes=_VMEM_LIMIT),
        cost_estimate=cost,
    )(x2d, w)


# ---------------------------- forward (wrapper) ----------------------------- #

def self_attention_forward(params, cache_k, cache_v, x, start_pos, cos, sin, cfg):
    """Functional equivalent of SelfAttention.forward.  Returns (out, cache_k, cache_v).

    `params` must come from prepare_attention_params (wq/wk columns pre-permuted into the
    per-head [real | imag] layout).  The KV cache is kept in
    (max_batch, n_kv_heads, max_seq, head_dim) layout so the flash kernel can index it
    directly (no per-step cache transpose); cached K is stored in the same permuted
    feature layout as Q, so attention scores are unchanged.
    # TODO(synk): the nn.Module mutates its cache in place; here caches are passed in and
    # returned (functional state).  Donate them under jit so the aliased writeback is
    # truly in-place.
    # TODO(synk): bucket/pad T = start_pos + S in production so decode does not recompile
    # the attention grid every step.
    """
    B, S, dim = x.shape
    Hq, Hkv, D = cfg["n_heads"], cfg["n_kv_heads"], cfg["head_dim"]
    n_rep = Hq // Hkv
    M = B * S
    T = start_pos + S

    x2d = x.reshape(M, dim)
    # RoPE tables at lane width D (f32 end-to-end): per-head pattern [cos|cos], [-sin|sin].
    cos2 = jnp.concatenate([cos, cos], axis=-1).astype(jnp.float32)      # (S, D)
    msin = jnp.concatenate([-sin, sin], axis=-1).astype(jnp.float32)     # (S, D)
    cos2_rows = jnp.broadcast_to(cos2[None], (B, S, D)).reshape(M, D)
    msin_rows = jnp.broadcast_to(msin[None], (B, S, D)).reshape(M, D)

    xq2, xk2, xv2 = qkv_rope_pallas(x2d, params["wq"], params["wk"], params["wv"],
                                    cos2_rows, msin_rows, Hq, Hkv, D)

    # Group-blocked layouts for the *new tokens only* (small; no cache-sized transposes).
    # TODO(synk): emit these layouts straight from the QKV / attention kernels' out_specs.
    xk_t = jnp.transpose(xk2.reshape(B, S, Hkv, D), (0, 2, 1, 3))        # (B, Hkv, S, D)
    xv_t = jnp.transpose(xv2.reshape(B, S, Hkv, D), (0, 2, 1, 3))
    qg = jnp.transpose(xq2.reshape(B, S, Hq, D), (0, 2, 1, 3)).reshape(B, Hkv, n_rep * S, D)

    # In-place KV-cache writeback: only the S new rows are written.
    cache_k, cache_v = kv_cache_update_pallas(xk_t, xv_t, cache_k, cache_v, start_pos)

    # Flash attention directly over the cache (no transposed / copied cache slice).
    out = flash_attention_pallas(qg, cache_k, cache_v, kv_len=T, batch=B)

    out = jnp.transpose(out.reshape(B, Hq, S, D), (0, 2, 1, 3)).reshape(M, Hq * D)
    out = matmul_pallas(out, params["wo"]).reshape(B, S, dim)
    return out, cache_k, cache_v


# --------------------------- pure-JAX reference ----------------------------- #

def _reference_rotary(x, cos, sin):
    B, S, H, D = x.shape
    xp = x.reshape(B, S, H, D // 2, 2)
    xr, xi = xp[..., 0], xp[..., 1]
    c = cos[None, :, None, :]
    s = sin[None, :, None, :]
    return jnp.stack([xr * c - xi * s, xr * s + xi * c], axis=-1).reshape(B, S, H, D)


def reference_forward(params, cache_k, cache_v, x, start_pos, cos, sin, cfg):
    B, S, dim = x.shape
    Hq, Hkv, D = cfg["n_heads"], cfg["n_kv_heads"], cfg["head_dim"]
    n_rep = Hq // Hkv
    xq = (x.reshape(B * S, dim) @ params["wq"]).reshape(B, S, Hq, D)
    xk = (x.reshape(B * S, dim) @ params["wk"]).reshape(B, S, Hkv, D)
    xv = (x.reshape(B * S, dim) @ params["wv"]).reshape(B, S, Hkv, D)
    xq = _reference_rotary(xq, cos, sin)
    xk = _reference_rotary(xk, cos, sin)
    cache_k = jax.lax.dynamic_update_slice(cache_k, xk, (0, start_pos, 0, 0))
    cache_v = jax.lax.dynamic_update_slice(cache_v, xv, (0, start_pos, 0, 0))
    T = start_pos + S
    keys = jnp.repeat(cache_k[:B, :T], n_rep, axis=2)
    values = jnp.repeat(cache_v[:B, :T], n_rep, axis=2)
    q = jnp.transpose(xq, (0, 2, 1, 3))
    k = jnp.transpose(keys, (0, 2, 1, 3))
    v = jnp.transpose(values, (0, 2, 1, 3))
    scores = jnp.einsum("bhsd,bhtd->bhst", q, k) / math.sqrt(D)
    p = jax.nn.softmax(scores.astype(jnp.float32), axis=-1).astype(q.dtype)
    out = jnp.einsum("bhst,bhtd->bhsd", p, v)
    out = jnp.transpose(out, (0, 2, 1, 3)).reshape(B * S, Hq * D)
    return (out @ params["wo"]).reshape(B, S, dim), cache_k, cache_v


# ---------------------------------- main ------------------------------------ #

if __name__ == "__main__":
    cfg = dict(dim=32, n_heads=4, n_kv_heads=2, head_dim=8,
               max_batch_size=2, max_seq_len=16)
    B, S = 2, 8

    key = jax.random.PRNGKey(0)
    kx, kx2, kq, kk, kv, ko = jax.random.split(key, 6)

    params = {
        "wq": 0.05 * jax.random.normal(kq, (cfg["dim"], cfg["n_heads"] * cfg["head_dim"]), jnp.float32),
        "wk": 0.05 * jax.random.normal(kk, (cfg["dim"], cfg["n_kv_heads"] * cfg["head_dim"]), jnp.float32),
        "wv": 0.05 * jax.random.normal(kv, (cfg["dim"], cfg["n_kv_heads"] * cfg["head_dim"]), jnp.float32),
        "wo": 0.05 * jax.random.normal(ko, (cfg["n_heads"] * cfg["head_dim"], cfg["dim"]), jnp.float32),
    }
    # One-time weight prep (the per-call gather from the previous revision is gone).
    params_p = prepare_attention_params(params, cfg["n_heads"], cfg["n_kv_heads"], cfg["head_dim"])

    # Pallas path keeps the cache in (max_batch, Hkv, max_seq, D) layout.
    cache_k_p = jnp.zeros((cfg["max_batch_size"], cfg["n_kv_heads"],
                           cfg["max_seq_len"], cfg["head_dim"]), jnp.float32)
    cache_v_p = jnp.zeros_like(cache_k_p)
    # Reference keeps the original (max_batch, max_seq, Hkv, D) layout.
    cache_k_r = jnp.zeros((cfg["max_batch_size"], cfg["max_seq_len"],
                           cfg["n_kv_heads"], cfg["head_dim"]), jnp.float32)
    cache_v_r = jnp.zeros_like(cache_k_r)

    half = cfg["head_dim"] // 2
    theta = 1.0 / (10000.0 ** (jnp.arange(0, half, dtype=jnp.float32) * 2.0 / cfg["head_dim"]))

    def rope_tables(start_pos, seq_len):
        pos = jnp.arange(start_pos, start_pos + seq_len, dtype=jnp.float32)
        ang = pos[:, None] * theta[None, :]
        return jnp.cos(ang), jnp.sin(ang)

    x1 = jax.random.normal(kx, (B, S, cfg["dim"]), jnp.float32)
    x2 = jax.random.normal(kx2, (B, 1, cfg["dim"]), jnp.float32)

    # Step 1: prefill (start_pos = 0, S = 8).
    cos1, sin1 = rope_tables(0, S)
    out1, cache_k_p, cache_v_p = self_attention_forward(
        params_p, cache_k_p, cache_v_p, x1, 0, cos1, sin1, cfg)
    ref1, cache_k_r, cache_v_r = reference_forward(
        params, cache_k_r, cache_v_r, x1, 0, cos1, sin1, cfg)

    # Step 2: single-token decode (start_pos = 8, S = 1) re-using the updated cache.
    cos2, sin2 = rope_tables(S, 1)
    out2, cache_k_p, cache_v_p = self_attention_forward(
        params_p, cache_k_p, cache_v_p, x2, S, cos2, sin2, cfg)
    ref2, cache_k_r, cache_v_r = reference_forward(
        params, cache_k_r, cache_v_r, x2, S, cos2, sin2, cfg)

    out1, out2 = jax.block_until_ready((out1, out2))

    assert out1.shape == (B, S, cfg["dim"]) and out2.shape == (B, 1, cfg["dim"])
    assert jnp.allclose(out1, ref1, atol=2e-4, rtol=2e-4), "prefill mismatch vs reference"
    assert jnp.allclose(out2, ref2, atol=2e-4, rtol=2e-4), "decode mismatch vs reference"

    print("KERNEL_OK")
</pallas_src>

<mosaic_0001>
module attributes {stable_mosaic.version = 11 : i64} {
  func.func @_qkv_rope_kernel(%arg0: i32, %arg1: i32, %arg2: memref<16x32xf32, #tpu.memory_space<vmem>>, %arg3: memref<32x32xf32, #tpu.memory_space<vmem>>, %arg4: memref<32x16xf32, #tpu.memory_space<vmem>>, %arg5: memref<32x16xf32, #tpu.memory_space<vmem>>, %arg6: memref<16x8xf32, #tpu.memory_space<vmem>>, %arg7: memref<16x8xf32, #tpu.memory_space<vmem>>, %arg8: memref<16x32xf32, #tpu.memory_space<vmem>>, %arg9: memref<16x16xf32, #tpu.memory_space<vmem>>, %arg10: memref<16x16xf32, #tpu.memory_space<vmem>>, %arg11: memref<16x32xf32, #tpu.memory_space<vmem>>, %arg12: memref<16x16xf32, #tpu.memory_space<vmem>>, %arg13: memref<16x16xf32, #tpu.memory_space<vmem>>) attributes {dimension_semantics = [#tpu.dimension_semantics<parallel>, #tpu.dimension_semantics<arbitrary>], iteration_bounds = array<i64: 1, 1>, scalar_prefetch = 0 : i64, scratch_operands = 3 : i64, tpu.core_type = #tpu.core_type<tc>, window_params = [{transform_indices = @transform_0, window_bounds = array<i64: 16, 32>}, {transform_indices = @transform_1, window_bounds = array<i64: 32, 32>}, {transform_indices = @transform_2, window_bounds = array<i64: 32, 16>}, {transform_indices = @transform_3, window_bounds = array<i64: 32, 16>}, {transform_indices = @transform_4, window_bounds = array<i64: 16, 8>}, {transform_indices = @transform_5, window_bounds = array<i64: 16, 8>}, {transform_indices = @transform_6, window_bounds = array<i64: 16, 32>}, {transform_indices = @transform_7, window_bounds = array<i64: 16, 16>}, {transform_indices = @transform_8, window_bounds = array<i64: 16, 16>}]} {
    %c0_i32 = arith.constant 0 : i32
    %0 = arith.cmpi eq, %arg1, %c0_i32 : i32
    %1 = arith.extui %0 : i1 to i32
    %c0_i32_0 = arith.constant 0 : i32
    %2 = arith.cmpi ne, %1, %c0_i32_0 : i32
    scf.if %2 {
      %cst_24 = arith.constant 0.000000e+00 : f32
      %22 = vector.broadcast %cst_24 : f32 to vector<16x32xf32>
      %c0_25 = arith.constant 0 : index
      %c0_26 = arith.constant 0 : index
      %23 = vector.load %arg11[%c0_25, %c0_26] : memref<16x32xf32, #tpu.memory_space<vmem>>, vector<16x32xf32>
      tpu.vector_store %arg11[%c0_25, %c0_26], %22 {strides = array<i32>} : memref<16x32xf32, #tpu.memory_space<vmem>>, vector<16x32xf32>,
      %cst_27 = arith.constant 0.000000e+00 : f32
      %24 = vector.broadcast %cst_27 : f32 to vector<16x16xf32>
      %c0_28 = arith.constant 0 : index
      %c0_29 = arith.constant 0 : index
      %25 = vector.load %arg12[%c0_28, %c0_29] : memref<16x16xf32, #tpu.memory_space<vmem>>, vector<16x16xf32>
      tpu.vector_store %arg12[%c0_28, %c0_29], %24 {strides = array<i32>} : memref<16x16xf32, #tpu.memory_space<vmem>>, vector<16x16xf32>,
      %cst_30 = arith.constant 0.000000e+00 : f32
      %26 = vector.broadcast %cst_30 : f32 to vector<16x16xf32>
      %c0_31 = arith.constant 0 : index
      %c0_32 = arith.constant 0 : index
      %27 = vector.load %arg13[%c0_31, %c0_32] : memref<16x16xf32, #tpu.memory_space<vmem>>, vector<16x16xf32>
      tpu.vector_store %arg13[%c0_31, %c0_32], %26 {strides = array<i32>} : memref<16x16xf32, #tpu.memory_space<vmem>>, vector<16x16xf32>,
    } else {
    }
    %c0 = arith.constant 0 : index
    %c0_1 = arith.constant 0 : index
    %3 = vector.load %arg2[%c0, %c0_1] : memref<16x32xf32, #tpu.memory_space<vmem>>, vector<16x32xf32>
    %c0_2 = arith.constant 0 : index
    %c0_3 = arith.constant 0 : index
    %4 = vector.load %arg11[%c0_2, %c0_3] : memref<16x32xf32, #tpu.memory_space<vmem>>, vector<16x32xf32>
    %c0_4 = arith.constant 0 : index
    %c0_5 = arith.constant 0 : index
    %5 = vector.load %arg3[%c0_4, %c0_5] : memref<32x32xf32, #tpu.memory_space<vmem>>, vector<32x32xf32>
    %cst = arith.constant dense<0.000000e+00> : vector<16x32xf32>
    %6 = tpu.matmul %3, %5, %cst {dimension_numbers = #tpu.dot_dimension_numbers<[1], [0], [0], [1], [0, 0, 1, 1], [], []>} : vector<16x32xf32>, vector<32x32xf32>, vector<16x32xf32> -> vector<16x32xf32>
    %7 = arith.addf %4, %6 : vector<16x32xf32>
    %c0_6 = arith.constant 0 : index
    %c0_7 = arith.constant 0 : index
    %8 = vector.load %arg11[%c0_6, %c0_7] : memref<16x32xf32, #tpu.memory_space<vmem>>, vector<16x32xf32>
    tpu.vector_store %arg11[%c0_6, %c0_7], %7 {strides = array<i32>} : memref<16x32xf32, #tpu.memory_space<vmem>>, vector<16x32xf32>,
    %c0_8 = arith.constant 0 : index
    %c0_9 = arith.constant 0 : index
    %9 = vector.load %arg12[%c0_8, %c0_9] : memref<16x16xf32, #tpu.memory_space<vmem>>, vector<16x16xf32>
    %c0_10 = arith.constant 0 : index
    %c0_11 = arith.constant 0 : index
    %10 = vector.load %arg4[%c0_10, %c0_11] : memref<32x16xf32, #tpu.memory_space<vmem>>, vector<32x16xf32>
    %cst_12 = arith.constant dense<0.000000e+00> : vector<16x16xf32>
    %11 = tpu.matmul %3, %10, %cst_12 {dimension_numbers = #tpu.dot_dimension_numbers<[1], [0], [0], [1], [0, 0, 1, 1], [], []>} : vector<16x32xf32>, vector<32x16xf32>, vector<16x16xf32> -> vector<16x16xf32>
    %12 = arith.addf %9, %11 : vector<16x16xf32>
    %c0_13 = arith.constant 0 : index
    %c0_14 = arith.constant 0 : index
    %13 = vector.load %arg12[%c0_13, %c0_14] : memref<16x16xf32, #tpu.memory_space<vmem>>, vector<16x16xf32>
    tpu.vector_store %arg12[%c0_13, %c0_14], %12 {strides = array<i32>} : memref<16x16xf32, #tpu.memory_space<vmem>>, vector<16x16xf32>,
    %c0_15 = arith.constant 0 : index
    %c0_16 = arith.constant 0 : index
    %14 = vector.load %arg13[%c0_15, %c0_16] : memref<16x16xf32, #tpu.memory_space<vmem>>, vector<16x16xf32>
    %c0_17 = arith.constant 0 : index
    %c0_18 = arith.constant 0 : index
    %15 = vector.load %arg5[%c0_17, %c0_18] : memref<32x16xf32, #tpu.memory_space<vmem>>, vector<32x16xf32>
    %cst_19 = arith.constant dense<0.000000e+00> : vector<16x16xf32>
    %16 = tpu.matmul %3, %15, %cst_19 {dimension_numbers = #tpu.dot_dimension_numbers<[1], [0], [0], [1], [0, 0, 1, 1], [], []>} : vector<16x32xf32>, vector<32x16xf32>, vector<16x16xf32> -> vector<16x16xf32>
    %17 = arith.addf %14, %16 : vector<16x16xf32>
    %c0_20 = arith.constant 0 : index
    %c0_21 = arith.constant 0 : index
    %18 = vector.load %arg13[%c0_20, %c0_21] : memref<16x16xf32, #tpu.memory_space<vmem>>, vector<16x16xf32>
    tpu.vector_store %arg13[%c0_20, %c0_21], %17 {strides = array<i32>} : memref<16x16xf32, #tpu.memory_space<vmem>>, vector<16x16xf32>,
    %c0_i32_22 = arith.constant 0 : i32
    %19 = arith.cmpi eq, %arg1, %c0_i32_22 : i32
    %20 = arith.extui %19 : i1 to i32
    %c0_i32_23 = arith.constant 0 : i32
    %21 = arith.cmpi ne, %20, %c0_i32_23 : i32
    scf.if %21 {
      %c0_24 = arith.constant 0 : index
      %c0_25 = arith.constant 0 : index
      %22 = vector.load %arg6[%c0_24, %c0_25] : memref<16x8xf32, #tpu.memory_space<vmem>>, vector<16x8xf32>
      %c0_26 = arith.constant 0 : index
      %c0_27 = arith.constant 0 : index
      %23 = vector.load %arg7[%c0_26, %c0_27] : memref<16x8xf32, #tpu.memory_space<vmem>>, vector<16x8xf32>
      %24 = tpu.concatenate %22, %22 in 1 : vector<16x8xf32>, vector<16x8xf32> -> vector<16x16xf32>
      %25 = tpu.concatenate %23, %23 in 1 : vector<16x8xf32>, vector<16x8xf32> -> vector<16x16xf32>
      %cst_28 = arith.constant 0.353553385 : f32
      %26 = vector.broadcast %cst_28 : f32 to vector<16x8xf32>
      %27 = arith.mulf %22, %26 : vector<16x8xf32>
      %28 = tpu.concatenate %27, %27, %27, %27 in 1 : vector<16x8xf32>, vector<16x8xf32>, vector<16x8xf32>, vector<16x8xf32> -> vector<16x32xf32>
      %cst_29 = arith.constant 0.353553385 : f32
      %29 = vector.broadcast %cst_29 : f32 to vector<16x8xf32>
      %30 = arith.mulf %23, %29 : vector<16x8xf32>
      %31 = tpu.concatenate %30, %30, %30, %30 in 1 : vector<16x8xf32>, vector<16x8xf32>, vector<16x8xf32>, vector<16x8xf32> -> vector<16x32xf32>
      %c0_30 = arith.constant 0 : index
      %c0_31 = arith.constant 0 : index
      %32 = vector.load %arg11[%c0_30, %c0_31] : memref<16x32xf32, #tpu.memory_space<vmem>>, vector<16x32xf32>
      %33 = tpu.iota {dimensions = array<i32: 1>} : vector<16x32xi32>
      %c8_i32 = arith.constant 8 : i32
      %c0_i32_32 = arith.constant 0 : i32
      %34 = arith.cmpi eq, %c8_i32, %c0_i32_32 : i32
      %c1_i32 = arith.constant 1 : i32
      %35 = arith.select %34, %c1_i32, %c8_i32 : i32
      %36 = vector.broadcast %35 : i32 to vector<16x32xi32>
      %37 = arith.remsi %33, %36 : vector<16x32xi32>
      %c0_i32_33 = arith.constant 0 : i32
      %38 = vector.broadcast %c0_i32_33 : i32 to vector<16x32xi32>
      %39 = arith.cmpi ne, %37, %38 : vector<16x32xi32>
      %c0_i32_34 = arith.constant 0 : i32
      %40 = vector.broadcast %c0_i32_34 : i32 to vector<16x32xi32>
      %41 = arith.cmpi slt, %37, %40 : vector<16x32xi32>
      %c0_i32_35 = arith.constant 0 : i32
      %42 = arith.cmpi slt, %35, %c0_i32_35 : i32
      %43 = vector.broadcast %42 : i1 to vector<16x32xi1>
      %44 = vector.broadcast %43 : vector<16x32xi1> to vector<16x32xi1>
      %45 = arith.xori %41, %44 : vector<16x32xi1>
      %46 = arith.andi %45, %39 : vector<16x32xi1>
      %47 = vector.broadcast %35 : i32 to vector<16x32xi32>
      %48 = arith.addi %37, %47 : vector<16x32xi32>
      %49 = arith.select %46, %48, %37 : vector<16x32xi1>, vector<16x32xi32>
      %c4_i32 = arith.constant 4 : i32
      %50 = vector.broadcast %c4_i32 : i32 to vector<16x32xi32>
      %51 = arith.cmpi slt, %49, %50 : vector<16x32xi32>
      %52 = vector.extract_strided_slice %32 {offsets = [0, 4], sizes = [16, 28], strides = [1, 1]} : vector<16x32xf32> to vector<16x28xf32>
      %53 = vector.extract_strided_slice %32 {offsets = [0, 0], sizes = [16, 4], strides = [1, 1]} : vector<16x32xf32> to vector<16x4xf32>
      %54 = tpu.concatenate %52, %53 in 1 : vector<16x28xf32>, vector<16x4xf32> -> vector<16x32xf32>
      %55 = vector.extract_strided_slice %32 {offsets = [0, 28], sizes = [16, 4], strides = [1, 1]} : vector<16x32xf32> to vector<16x4xf32>
      %56 = vector.extract_strided_slice %32 {offsets = [0, 0], sizes = [16, 28], strides = [1, 1]} : vector<16x32xf32> to vector<16x28xf32>
      %57 = tpu.concatenate %55, %56 in 1 : vector<16x4xf32>, vector<16x28xf32> -> vector<16x32xf32>
      %58 = arith.select %51, %54, %57 : vector<16x32xi1>, vector<16x32xf32>
      %59 = arith.mulf %32, %28 : vector<16x32xf32>
      %60 = arith.mulf %58, %31 : vector<16x32xf32>
      %61 = arith.addf %59, %60 : vector<16x32xf32>
      %c0_36 = arith.constant 0 : index
      %c0_37 = arith.constant 0 : index
      %62 = vector.load %arg8[%c0_36, %c0_37] : memref<16x32xf32, #tpu.memory_space<vmem>>, vector<16x32xf32>
      tpu.vector_store %arg8[%c0_36, %c0_37], %61 {strides = array<i32>} : memref<16x32xf32, #tpu.memory_space<vmem>>, vector<16x32xf32>,
      %c0_38 = arith.constant 0 : index
      %c0_39 = arith.constant 0 : index
      %63 = vector.load %arg12[%c0_38, %c0_39] : memref<16x16xf32, #tpu.memory_space<vmem>>, vector<16x16xf32>
      %64 = tpu.iota {dimensions = array<i32: 1>} : vector<16x16xi32>
      %c8_i32_40 = arith.constant 8 : i32
      %c0_i32_41 = arith.constant 0 : i32
      %65 = arith.cmpi eq, %c8_i32_40, %c0_i32_41 : i32
      %c1_i32_42 = arith.constant 1 : i32
      %66 = arith.select %65, %c1_i32_42, %c8_i32_40 : i32
      %67 = vector.broadcast %66 : i32 to vector<16x16xi32>
      %68 = arith.remsi %64, %67 : vector<16x16xi32>
      %c0_i32_43 = arith.constant 0 : i32
      %69 = vector.broadcast %c0_i32_43 : i32 to vector<16x16xi32>
      %70 = arith.cmpi ne, %68, %69 : vector<16x16xi32>
      %c0_i32_44 = arith.constant 0 : i32
      %71 = vector.broadcast %c0_i32_44 : i32 to vector<16x16xi32>
      %72 = arith.cmpi slt, %68, %71 : vector<16x16xi32>
      %c0_i32_45 = arith.constant 0 : i32
      %73 = arith.cmpi slt, %66, %c0_i32_45 : i32
      %74 = vector.broadcast %73 : i1 to vector<16x16xi1>
      %75 = vector.broadcast %74 : vector<16x16xi1> to vector<16x16xi1>
      %76 = arith.xori %72, %75 : vector<16x16xi1>
      %77 = arith.andi %76, %70 : vector<16x16xi1>
      %78 = vector.broadcast %66 : i32 to vector<16x16xi32>
      %79 = arith.addi %68, %78 : vector<16x16xi32>
      %80 = arith.select %77, %79, %68 : vector<16x16xi1>, vector<16x16xi32>
      %c4_i32_46 = arith.constant 4 : i32
      %81 = vector.broadcast %c4_i32_46 : i32 to vector<16x16xi32>
      %82 = arith.cmpi slt, %80, %81 : vector<16x16xi32>
      %83 = vector.extract_strided_slice %63 {offsets = [0, 4], sizes = [16, 12], strides = [1, 1]} : vector<16x16xf32> to vector<16x12xf32>
      %84 = vector.extract_strided_slice %63 {offsets = [0, 0], sizes = [16, 4], strides = [1, 1]} : vector<16x16xf32> to vector<16x4xf32>
      %85 = tpu.concatenate %83, %84 in 1 : vector<16x12xf32>, vector<16x4xf32> -> vector<16x16xf32>
      %86 = vector.extract_strided_slice %63 {offsets = [0, 12], sizes = [16, 4], strides = [1, 1]} : vector<16x16xf32> to vector<16x4xf32>
      %87 = vector.extract_strided_slice %63 {offsets = [0, 0], sizes = [16, 12], strides = [1, 1]} : vector<16x16xf32> to vector<16x12xf32>
      %88 = tpu.concatenate %86, %87 in 1 : vector<16x4xf32>, vector<16x12xf32> -> vector<16x16xf32>
      %89 = arith.select %82, %85, %88 : vector<16x16xi1>, vector<16x16xf32>
      %90 = arith.mulf %63, %24 : vector<16x16xf32>
      %91 = arith.mulf %89, %25 : vector<16x16xf32>
      %92 = arith.addf %90, %91 : vector<16x16xf32>
      %c0_47 = arith.constant 0 : index
      %c0_48 = arith.constant 0 : index
      %93 = vector.load %arg9[%c0_47, %c0_48] : memref<16x16xf32, #tpu.memory_space<vmem>>, vector<16x16xf32>
      tpu.vector_store %arg9[%c0_47, %c0_48], %92 {strides = array<i32>} : memref<16x16xf32, #tpu.memory_space<vmem>>, vector<16x16xf32>,
      %c0_49 = arith.constant 0 : index
      %c0_50 = arith.constant 0 : index
      %94 = vector.load %arg13[%c0_49, %c0_50] : memref<16x16xf32, #tpu.memory_space<vmem>>, vector<16x16xf32>
      %c0_51 = arith.constant 0 : index
      %c0_52 = arith.constant 0 : index
      %95 = vector.load %arg10[%c0_51, %c0_52] : memref<16x16xf32, #tpu.memory_space<vmem>>, vector<16x16xf32>
      tpu.vector_store %arg10[%c0_51, %c0_52], %94 {strides = array<i32>} : memref<16x16xf32, #tpu.memory_space<vmem>>, vector<16x16xf32>,
    } else {
    }
    return
  }
  func.func @transform_0(%arg0: i32, %arg1: i32) -> (i32, i32) {
    %c0_i32 = arith.constant 0 : i32
    return %arg0, %arg1 : i32, i32
  }
  func.func @transform_1(%arg0: i32, %arg1: i32) -> (i32, i32) {
    %c0_i32 = arith.constant 0 : i32
    %c0_i32_0 = arith.constant 0 : i32
    return %arg1, %c0_i32 : i32, i32
  }
  func.func @transform_2(%arg0: i32, %arg1: i32) -> (i32, i32) {
    %c0_i32 = arith.constant 0 : i32
    %c0_i32_0 = arith.constant 0 : i32
    return %arg1, %c0_i32 : i32, i32
  }
  func.func @transform_3(%arg0: i32, %arg1: i32) -> (i32, i32) {
    %c0_i32 = arith.constant 0 : i32
    %c0_i32_0 = arith.constant 0 : i32
    return %arg1, %c0_i32 : i32, i32
  }
  func.func @transform_4(%arg0: i32, %arg1: i32) -> (i32, i32) {
    %c0_i32 = arith.constant 0 : i32
    %c0_i32_0 = arith.constant 0 : i32
    return %arg0, %c0_i32 : i32, i32
  }
  func.func @transform_5(%arg0: i32, %arg1: i32) -> (i32, i32) {
    %c0_i32 = arith.constant 0 : i32
    %c0_i32_0 = arith.constant 0 : i32
    return %arg0, %c0_i32 : i32, i32
  }
  func.func @transform_6(%arg0: i32, %arg1: i32) -> (i32, i32) {
    %c0_i32 = arith.constant 0 : i32
    %c0_i32_0 = arith.constant 0 : i32
    return %arg0, %c0_i32 : i32, i32
  }
  func.func @transform_7(%arg0: i32, %arg1: i32) -> (i32, i32) {
    %c0_i32 = arith.constant 0 : i32
    %c0_i32_0 = arith.constant 0 : i32
    return %arg0, %c0_i32 : i32, i32
  }
  func.func @transform_8(%arg0: i32, %arg1: i32) -> (i32, i32) {
    %c0_i32 = arith.constant 0 : i32
    %c0_i32_0 = arith.constant 0 : i32
    return %arg0, %c0_i32 : i32, i32
  }
}

</mosaic_0001>

<bundles_post_ra>
// kernel: tpu_custom_call.1
= control target key start
LH: loop header
LB: loop body
LE: loop exit
PB: predicated region body
PF: predicated region fallthrough
CT: control target
= control target key end

     0   :  { %14 = vsyncpa [#allocation6], 0  ;;  %vm32_vm0 = vcmask 261120   ;;  %vm35_vm1 = vcmask 130048   ;;  %v708_v10 = vmov 0.0   ;;  %s709_s11 = smov 8   ;;  %s1043_s0 = inlined_call_operand.vmem [shape: f32[16,32], index: 0, kind: input, shape index: {}]   ;;  %s1044_s1 = inlined_call_operand.vmem [shape: f32[32,32], index: 1, kind: input, shape index: {}]   ;;  %s1045_s2 = inlined_call_operand.vmem [shape: f32[32,16], index: 2, kind: input, shape index: {}]   ;;  %s1046_s3 = inlined_call_operand.vmem [shape: f32[32,16], index: 3, kind: input, shape index: {}]   ;;  %s1047_s4 = inlined_call_operand.vmem [shape: f32[16,8], index: 4, kind: input, shape index: {}]   ;;  %s1048_s5 = inlined_call_operand.vmem [shape: f32[16,8], index: 5, kind: input, shape index: {}]   ;;  %s1049_s6 = inlined_call_operand.hbm [shape: f32[16,32], index: 6, kind: output, shape index: {0}]   ;;  %s1050_s7 = inlined_call_operand.hbm [shape: f32[16,16], index: 7, kind: output, shape index: {1}]   ;;  %s1051_s8 = inlined_call_operand.hbm [shape: f32[16,16], index: 8, kind: output, shape index: {2}]  }
   0x1   :  { %v136_v0 = vld [vmem:[%s1045_s2] sm:$0xff]  ;;  %v137_v1 = vld [vmem:[%s1045_s2 + $0x8] sm:$0xff]  ;;  %v138_v2 = vld [vmem:[%s1045_s2 + $0x10] sm:$0xff]  ;;  %37 = vst.msk [vmem:[#allocation3 + $0x8] sm:$0xff] %vm35_vm1, %v708_v10 }
   0x2   :  { %v608_v3 = vpack.c.bf16 %v137_v1, %v136_v0  ;;  %v139_v4 = vld [vmem:[%s1045_s2 + $0x18] sm:$0xff]  ;;  %v40_v5 = vld [vmem:[%s1043_s0] sm:$0xff]  ;;  %v45_v8 = vld [vmem:[%s1044_s1 + $0x8] sm:$0xff]  ;;  %33 = vst.msk [vmem:[#allocation2] sm:$0xff] %vm32_vm0, %v708_v10 }
   0x3   :  { %v612_v6 = vpack.c.bf16 %v139_v4, %v138_v2  ;;  %586 = vmatprep.mubr.msk.f32.mxu1 %vm32_vm0, %v40_v5  ;;  %v44_v7 = vld [vmem:[%s1044_s1] sm:$0xff]  ;;  %v46_v9 = vld [vmem:[%s1044_s1 + $0x10] sm:$0xff]  ;;  %575 = vmatprep.mubr.msk.f32.mxu0 %vm32_vm0, %v40_v5  ;;  %34 = vst.msk [vmem:[#allocation2 + $0x8] sm:$0xff] %vm32_vm0, %v708_v10  ;;  %v47_v12 = vld [vmem:[%s1044_s1 + $0x18] sm:$0xff] }
   0x4   :  { %36 = vst.msk [vmem:[#allocation3] sm:$0xff] %vm35_vm1, %v708_v10  ;;  %38 = vst.msk [vmem:[#allocation4] sm:$0xff] %vm35_vm1, %v708_v10  ;;  %609 = vmatprep.subr.bf16.mxu1 %v608_v3  ;;  %v600_v11 = vpack.c.bf16 %v45_v8, %v44_v7  ;;  %v805_v13 = vld [vmem:[%s1048_s5] sm:$0xff]  ;;  %v604_v15 = vpack.c.bf16 %v47_v12, %v46_v9  ;;  %v821_v18 = vld [vmem:[%s1048_s5 + $0x8] sm:$0xff] }
   0x5   :  { %39 = vst.msk [vmem:[#allocation4 + $0x8] sm:$0xff] %vm35_vm1, %v708_v10  ;;  %v810_v14 = vld [vmem:[%s1047_s4] sm:$0xff]  ;;  %611 = vmatpush3.bf16.msra.mxu1 %v608_v3  ;;  %v813_v16 = vmul.f32 0.35355338, %v805_v13  ;;  %v826_v19 = vld [vmem:[%s1047_s4 + $0x8] sm:$0xff] }
   0x6   :  { %v816_v17 = vmul.f32 0.35355338, %v810_v14  ;;  %613 = vmatprep.subr.bf16.mxu1 %v612_v6  ;;  %601 = vmatprep.subr.bf16.mxu0 %v600_v11  ;;  %v222_v20 = vld [vmem:[%s1046_s3] sm:$0xff]  ;;  %v223_v21 = vld [vmem:[%s1046_s3 + $0x8] sm:$0xff]  ;;  %v837_v22 = vmul.f32 0.35355338, %v821_v18 }
   0x7   :  { %603 = vmatpush3.bf16.msra.mxu0 %v600_v11  ;;  %366 = vrot.lane.b32.xlu1 %v813_v16, %s709_s11 }
   0x8   :  { %15 = vsyncpa [#allocation8], 0  ;;  %605 = vmatprep.subr.bf16.mxu0 %v604_v15  ;;  %337 = vrot.lane.b32.xlu0 %v816_v17, %s709_s11  ;;  %v842_v23 = vmul.f32 0.35355338, %v826_v19  ;;  %v41_v24 = vld [vmem:[%s1043_s0 + $0x8] sm:$0xff]  ;;  %v616_v25 = vpack.c.bf16 %v223_v21, %v222_v20  ;;  %v224_v26 = vld [vmem:[%s1046_s3 + $0x10] sm:$0xff]  ;;  %v392_v3 = vlaneseq }
   0x9   :  { %615 = vmatpush3.bf16.msra.mxu1 %v612_v6  ;;  %v225_v27 = vld [vmem:[%s1046_s3 + $0x18] sm:$0xff]  ;;  %s710_s0 = smov 16   ;;  %s711_s3 = smov 24   ;;  %v42_v35 = vld [vmem:[#allocation2] sm:$0xff]  ;;  %vm320_vm2 = vcmask 64512   ;;  %vm465_vm3 = vcmask 97280  }
   0xa   :  { %v620_v28 = vpack.c.bf16 %v225_v27, %v224_v26  ;;  %v135_v29 = vld [vmem:[#allocation3 + $0x8] sm:$0xff]  ;;  %v43_v32 = vld [vmem:[#allocation2 + $0x8] sm:$0xff]  ;;  %s712_s16 = smov 124   ;;  %s713_s17 = smov 12   ;;  %v393_v6 = vand.u32 127, %v392_v3  ;;  %vm436_vm4 = vcmask 31744  }
   0xb   :  { %607 = vmatpush3.bf16.msra.mxu0 %v604_v15  ;;  %368 = vrot.lane.b32.xlu1 %v837_v22, %s709_s11  ;;  %v134_v30 = vld [vmem:[#allocation3] sm:$0xff]  ;;  %s714_s18 = smov 116   ;;  %v220_v45 = vld [vmem:[#allocation4] sm:$0xff]  ;;  %s715_s19 = smov 4  }
   0xc   :  { %587 = vmatmul.mubr.msk.f32.vlgmr.msra.gmra.mrb[0].mxu1 %vm32_vm0, %v41_v24  ;;  %339 = vrot.lane.b32.xlu0 %v842_v23, %s709_s11  ;;  %v221_v43 = vld [vmem:[#allocation4 + $0x8] sm:$0xff]  ;;  %s716_s20 = smov 28   ;;  %s717_s2 = smov 100   ;;  %v398_v9 = vand.u32 7, %v393_v6 }
   0xd   :  { %617 = vmatprep.subr.bf16.mxu0 %v616_v25  ;;  %s718_s21 = smov [#allocation7]   ;;  %s719_s23 = smov [#allocation9]  }
   0xe   :  { %576 = vmatmul.mubr.msk.f32.vlgmr.msra.gmra.mrb[0].mxu0 %vm32_vm0, %v41_v24  ;;  %vm933_vm5 = vcmp.lt.s32.totalorder %v398_v9, 4  ;;  %s513_s22 = sshll.u32 %s718_s21, 4  ;;  %s525_s24 = sshll.u32 %s719_s23, 4  ;;  %s514_s22 = int_to_ptr.vmem [resolvable:$true] %s513_s22  ;;  %s954_s24 = int_to_ptr.vmem [resolvable:$true] %s525_s24 }
   0xf   :  { %316 = vrot.lane.b32.xlu1 %v826_v19, %s709_s11  ;;  %619 = vmatpush3.bf16.msra.mxu0 %v616_v25  ;;  %s638_s25 = scalar_lea.vmem %s514_s22, 256  ;;  %p643_p1 = scmp.lt.s32.totalorder %s514_s22, %s514_s22 }
  0x10   :  { %314 = vrot.lane.b32.xlu0 %v810_v14, %s709_s11  ;;  %621 = vmatprep.subr.bf16.mxu0 %v620_v28  ;;  %p639_p0 = scmp.ne.s32.totalorder %s514_s22, %s638_s25  ;;  %p644_p2 = scmp.lt.s32.totalorder %s638_s25, %s638_s25 }
  0x11   :  { %597 = vmatprep.mubr.msk.f32.mxu0 %vm32_vm0, %v40_v5 }
  0x12   :  { %p645_p3 = por %p644_p2, %p643_p1 }
  0x13   :  { %327 = vrot.lane.b32.xlu1 %v821_v18, %s709_s11  ;;  %623 = vmatpush3.bf16.msra.mxu0 %v620_v28 }
  0x14   :  { %325 = vrot.lane.b32.xlu0 %v805_v13, %s709_s11  ;;  %p646_p4 = pnand %p645_p3, %p639_p0 }
  0x16   :  { %598 = vmatmul.mubr.msk.f32.vlgmr.msra.gmra.mrb[2].mxu0 %vm32_vm0, %v41_v24 }
  0x17   :  { %345 = vrot.lane.b32.xlu1 %v842_v23, %s710_s0 }
  0x18   :  { %343 = vrot.lane.b32.xlu0 %v816_v17, %s710_s0 }
  0x1b   :  { %374 = vrot.lane.b32.xlu1 %v837_v22, %s710_s0 }
  0x1c   :  { %372 = vrot.lane.b32.xlu0 %v813_v16, %s710_s0 }
  0x1f   :  { %351 = vrot.lane.b32.xlu1 %v842_v23, %s711_s3 }
  0x20   :  { %349 = vrot.lane.b32.xlu0 %v816_v17, %s711_s3 }
  0x79   :  { %v913_v53 = vpop.permute.xlu1 %366 }
  0x7a   :  { %v915_v54 = vpop.permute.xlu0 %337 }
  0x7d   :  { %v917_v55 = vpop.permute.xlu1 %368 }
  0x7e   :  { %v919_v56 = vpop.permute.xlu0 %339 }
  0x81   :  { %v317_v57 = vpop.permute.xlu1 %316 }
  0x82   :  { %v315_v58 = vpop.permute.xlu0 %314  ;;  %v322_v15 = vsel %vm320_vm2, %v826_v19, %v317_v57 }
  0x83   :  { %v321_v21 = vsel %vm320_vm2, %v810_v14, %v315_v58 }
  0x85   :  { %v328_v59 = vpop.permute.xlu1 %327 }
  0x86   :  { %v326_v60 = vpop.permute.xlu0 %325  ;;  %v332_v27 = vsel %vm320_vm2, %v821_v18, %v328_v59 }
  0x87   :  { %v331_v19 = vsel %vm320_vm2, %v805_v13, %v326_v60 }
  0x89   :  { %v921_v61 = vpop.permute.xlu1 %345 }
  0x8a   :  { %v923_v62 = vpop.permute.xlu0 %343 }
  0x8d   :  { %v925_v63 = vpop.permute.xlu1 %374 }
  0x8e   :  { %v927_v0 = vpop.permute.xlu0 %372 }
  0x91   :  { %v929_v1 = vpop.permute.xlu1 %351 }
  0x92   :  { %v931_v2 = vpop.permute.xlu0 %349 }
  0xdf   :  { %v588_v31 = vpop.f32.mrb[0].mxu1 }
  0xe0   :  { %v216_v33 = vadd.f32 %v588_v31, %v135_v29  ;;  %v206_v34 = vpop.f32.mrb[1].mxu1 }
  0xe1   :  { %v215_v36 = vadd.f32 %v206_v34, %v134_v30  ;;  %v577_v37 = vpop.f32.mrb[0].mxu0 }
  0xe2   :  { %219 = vst.msk [vmem:[#allocation3 + $0x8] sm:$0xff] %vm35_vm1, %v216_v33  ;;  %v131_v38 = vadd.f32 %v577_v37, %v43_v32  ;;  %v121_v39 = vpop.f32.mrb[1].mxu0 }
  0xe3   :  { %218 = vst.msk [vmem:[#allocation3] sm:$0xff] %vm35_vm1, %v215_v36  ;;  %v130_v40 = vadd.f32 %v121_v39, %v42_v35 }
  0xe4   :  { %133 = vst.msk [vmem:[#allocation2 + $0x8] sm:$0xff] %vm32_vm0, %v131_v38 }
  0xe5   :  { %132 = vst.msk [vmem:[#allocation2] sm:$0xff] %vm32_vm0, %v130_v40 }
  0xe9   :  { %v881_v41 = vld [vmem:[#allocation3 + $0x8] sm:$0xff]  ;;  %v599_v44 = vpop.f32.mrb[2].mxu0 }
  0xea   :  { %v883_v42 = vld [vmem:[#allocation3] sm:$0xff]  ;;  %455 = vrot.lane.b32.xlu1 %v881_v41, %s712_s16  ;;  %v302_v46 = vadd.f32 %v599_v44, %v221_v43  ;;  %v292_v47 = vpop.f32.mrb[3].mxu0  ;;  %v485_v31 = vmul.f32 %v881_v41, %v322_v15 }
  0xeb   :  { %453 = vrot.lane.b32.xlu0 %v883_v42, %s712_s16  ;;  %v893_v48 = vld [vmem:[#allocation2 + $0x8] sm:$0xff]  ;;  %v301_v49 = vadd.f32 %v292_v47, %v220_v45  ;;  %v484_v33 = vmul.f32 %v883_v42, %v321_v21 }
  0xec   :  { %v895_v50 = vld [vmem:[#allocation2] sm:$0xff]  ;;  %304 = vst.msk [vmem:[#allocation4 + $0x8] sm:$0xff] %vm35_vm1, %v302_v46 }
  0xed   :  { %303 = vst.msk [vmem:[#allocation4] sm:$0xff] %vm35_vm1, %v301_v49 }
  0xee   :  { %461 = vrot.lane.b32.xlu1 %v881_v41, %s713_s17 }
  0xef   :  { %459 = vrot.lane.b32.xlu0 %v883_v42, %s713_s17 }
  0xf2   :  { %470 = vrot.lane.b32.xlu1 %v881_v41, %s714_s18 }
  0xf3   :  { %468 = vrot.lane.b32.xlu0 %v883_v42, %s714_s18  ;;  %v493_v52 = vld [vmem:[#allocation4 + $0x8] sm:$0xff] }
  0xf4   :  { %v492_v51 = vld [vmem:[#allocation4] sm:$0xff]  ;;  %495 = vst.msk [vmem:[#allocation9 + $0x8] sm:$0xff] %vm35_vm1, %v493_v52 }
  0xf5   :  { %494 = vst.msk [vmem:[#allocation9] sm:$0xff] %vm35_vm1, %v492_v51 }
  0xf6   :  { %476 = vrot.lane.b32.xlu1 %v881_v41, %s715_s19 }
  0xf7   :  { %474 = vrot.lane.b32.xlu0 %v883_v42, %s715_s19 }
  0xfa   :  { %411 = vrot.lane.b32.xlu1 %v893_v48, %s712_s16 }
  0xfb   :  { %409 = vrot.lane.b32.xlu0 %v895_v50, %s712_s16 }
  0xfe   :  { %417 = vrot.lane.b32.xlu1 %v893_v48, %s716_s20 }
  0xff   :  { %415 = vrot.lane.b32.xlu0 %v895_v50, %s716_s20 }
 0x102   :  { %426 = vrot.lane.b32.xlu1 %v893_v48, %s717_s2 }
 0x103   :  { %424 = vrot.lane.b32.xlu0 %v895_v50, %s717_s2 }
 0x106   :  { %432 = vrot.lane.b32.xlu1 %v893_v48, %s715_s19 }
 0x107   :  { %430 = vrot.lane.b32.xlu0 %v895_v50, %s715_s19 }
 0x10a   :  { %380 = vrot.lane.b32.xlu1 %v837_v22, %s711_s3 }
 0x10b   :  { %378 = vrot.lane.b32.xlu0 %v813_v16, %s711_s3 }
 0x15c   :  { %v456_v4 = vpop.permute.xlu1 %455 }
 0x15d   :  { %v454_v5 = vpop.permute.xlu0 %453 }
 0x160   :  { %v462_v7 = vpop.permute.xlu1 %461 }
 0x161   :  { %v460_v8 = vpop.permute.xlu0 %459  ;;  %v467_v24 = vsel %vm465_vm3, %v456_v4, %v462_v7 }
 0x162   :  { %v466_v28 = vsel %vm465_vm3, %v454_v5, %v460_v8 }
 0x164   :  { %v471_v10 = vpop.permute.xlu1 %470 }
 0x165   :  { %v469_v11 = vpop.permute.xlu0 %468 }
 0x168   :  { %v477_v20 = vpop.permute.xlu1 %476 }
 0x169   :  { %v481_v25 = vsel %vm436_vm4, %v471_v10, %v477_v20  ;;  %v475_v26 = vpop.permute.xlu0 %474 }
 0x16a   :  { %v483_v29 = vsel %vm933_vm5, %v467_v24, %v481_v25  ;;  %v480_v30 = vsel %vm436_vm4, %v469_v11, %v475_v26 }
 0x16b   :  { %v487_v32 = vmul.f32 %v483_v29, %v332_v27  ;;  %v482_v14 = vsel %vm933_vm5, %v466_v28, %v480_v30 }
 0x16c   :  { %v486_v18 = vmul.f32 %v482_v14, %v331_v19  ;;  %v412_v34 = vpop.permute.xlu1 %411 }
 0x16d   :  { %v489_v35 = vadd.f32 %v487_v32, %v485_v31  ;;  %v410_v36 = vpop.permute.xlu0 %409 }
 0x16e   :  { %v488_v37 = vadd.f32 %v486_v18, %v484_v33 }
 0x16f   :  { %491 = vst.msk [vmem:[#allocation7 + $0x8] sm:$0xff] %vm35_vm1, %v489_v35 }
 0x170   :  { %490 = vst.msk [vmem:[#allocation7] sm:$0xff] %vm35_vm1, %v488_v37  ;;  %v418_v13 = vpop.permute.xlu1 %417 }
 0x171   :  { %v416_v38 = vpop.permute.xlu0 %415 }
 0x172   :  { %649 = shalt.err (!%p646_p4)
}
 0x173   :  { %s650_s27 = scalar_lea.hbm %s1050_s7, 256 }
 0x174   :  { %p651_p5 = scmp.ne.s32.totalorder %s1050_s7, %s650_s27  ;;  %p654_p6 = scmp.lt.u32.totalorder %s650_s27, %s1050_s7 }
 0x176   :  { %p656_p7 = pnand %p654_p6, %p651_p5 }
 0x178   :  { %659 = shalt.err (!%p656_p7)
}
 0x179   :  { %s720_s10 = smov 128   ;;  %s660_s12 = scalar_lea.vmem %s954_s24, 256 }
 0x17a   :  { %519 = dma.vmem_to_hbm [thread:$0]  %s514_s22, 256, %s1050_s7, [#allocation8], %s720_s10, %s720_s10, %s709_s11  }
 0x17b   :  { %p661_p8 = scmp.ne.s32.totalorder %s954_s24, %s660_s12  ;;  %p665_p9 = scmp.lt.s32.totalorder %s954_s24, %s954_s24 }
 0x17c   :  { %p666_p10 = scmp.lt.s32.totalorder %s660_s12, %s660_s12 }
 0x17e   :  { %p667_p11 = por %p666_p10, %p665_p9 }
 0x180   :  { %p668_p12 = pnand %p667_p11, %p661_p8 }
 0x182   :  { %671 = shalt.err (!%p668_p12)
}
 0x183   :  { %s672_s15 = scalar_lea.hbm %s1051_s8, 256 }
 0x184   :  { %p673_p13 = scmp.ne.s32.totalorder %s1051_s8, %s672_s15  ;;  %p676_p0 = scmp.lt.u32.totalorder %s672_s15, %s1051_s8 }
 0x186   :  { %p678_p1 = pnand %p676_p0, %p673_p13 }
 0x188   :  { %681 = shalt.err (!%p678_p1)
}
 0x189   :  { %531 = dma.vmem_to_hbm [thread:$0]  %s954_s24, 256, %s1051_s8, [#allocation8], %s720_s10, %s720_s10, %s709_s11   ;;  %v427_v39 = vpop.permute.xlu1 %426  ;;  %v356_v40 = vsel %vm320_vm2, %v842_v23, %v919_v56  ;;  %v425_v41 = vpop.permute.xlu0 %424  ;;  %v355_v42 = vsel %vm320_vm2, %v816_v17, %v915_v54  ;;  %vm359_vm6 = vcmask 195584   ;;  %v385_v45 = vsel %vm320_vm2, %v837_v22, %v917_v55 }
 0x18a   :  { %v358_v43 = vsel %vm35_vm1, %v356_v40, %v921_v61  ;;  %v357_v46 = vsel %vm35_vm1, %v355_v42, %v923_v62  ;;  %vm421_vm7 = vcmask 228352   ;;  %v384_v23 = vsel %vm320_vm2, %v813_v16, %v913_v53  ;;  %s721_s8 = smov [#allocation5]  }
 0x18b   :  { %v361_v49 = vsel %vm359_vm6, %v358_v43, %v929_v1  ;;  %v387_v52 = vsel %vm35_vm1, %v385_v45, %v925_v63  ;;  %v360_v22 = vsel %vm359_vm6, %v357_v46, %v931_v2  ;;  %v423_v54 = vsel %vm421_vm7, %v412_v34, %v418_v13  ;;  %s501_s19 = sshll.u32 %s721_s8, 4  ;;  %s502_s19 = int_to_ptr.vmem [resolvable:$true] %s501_s19 }
 0x18c   :  { %v386_v56 = vsel %vm35_vm1, %v384_v23, %v927_v0  ;;  %v422_v57 = vsel %vm421_vm7, %v410_v36, %v416_v38  ;;  %v442_v59 = vmul.f32 %v893_v48, %v361_v49  ;;  %v441_v63 = vmul.f32 %v895_v50, %v360_v22  ;;  %s682_s20 = scalar_lea.vmem %s502_s19, 256  ;;  %p687_p3 = scmp.lt.s32.totalorder %s502_s19, %s502_s19 }
 0x18d   :  { %v433_v44 = vpop.permute.xlu1 %432  ;;  %v431_v47 = vpop.permute.xlu0 %430  ;;  %p683_p2 = scmp.ne.s32.totalorder %s502_s19, %s682_s20  ;;  %p688_p4 = scmp.lt.s32.totalorder %s682_s20, %s682_s20 }
 0x18e   :  { %v438_v17 = vsel %vm436_vm4, %v427_v39, %v433_v44  ;;  %v437_v51 = vsel %vm436_vm4, %v425_v41, %v431_v47 }
 0x18f   :  { %v440_v16 = vsel %vm933_vm5, %v423_v54, %v438_v17  ;;  %v439_v61 = vsel %vm933_vm5, %v422_v57, %v437_v51  ;;  %p689_p5 = por %p688_p4, %p687_p3 }
 0x191   :  { %v381_v55 = vpop.permute.xlu1 %380  ;;  %v379_v58 = vpop.permute.xlu0 %378  ;;  %p690_p6 = pnand %p689_p5, %p683_p2 }
 0x192   :  { %v389_v53 = vsel %vm359_vm6, %v387_v52, %v381_v55  ;;  %v388_v62 = vsel %vm359_vm6, %v386_v56, %v379_v58 }
 0x193   :  { %v444_v60 = vmul.f32 %v440_v16, %v389_v53  ;;  %v443_v0 = vmul.f32 %v439_v61, %v388_v62 }
 0x195   :  { %v446_v1 = vadd.f32 %v444_v60, %v442_v59  ;;  %v445_v2 = vadd.f32 %v443_v0, %v441_v63 }
 0x197   :  { %448 = vst.msk [vmem:[#allocation5 + $0x8] sm:$0xff] %vm32_vm0, %v446_v1  ;;  %447 = vst.msk [vmem:[#allocation5] sm:$0xff] %vm32_vm0, %v445_v2 }
 0x198   :  { %693 = shalt.err (!%p690_p6)
}
 0x199   :  { %s694_s22 = scalar_lea.hbm %s1049_s6, 256 }
 0x19a   :  { %p695_p7 = scmp.ne.s32.totalorder %s1049_s6, %s694_s22  ;;  %p698_p8 = scmp.lt.u32.totalorder %s694_s22, %s1049_s6 }
 0x19c   :  { %p700_p9 = pnand %p698_p8, %p695_p7 }
 0x19e   :  { %703 = shalt.err (!%p700_p9)
}
 0x19f   :  { %507 = dma.vmem_to_hbm [thread:$0]  %s502_s19, 256, %s1049_s6, [#allocation6], %s720_s10, %s720_s10, %s709_s11  }
 0x1a0   :  { %704 = dma.done.wait [#allocation6], 256  }
 0x1a1   :  { %705 = vsyncadd [#allocation6], 4294967040 }
 0x1a2   :  { %706 = dma.done.wait [#allocation8], 512  }
 0x1a3   :  { %707 = vsyncadd [#allocation8], 4294966784 }
 0x1a4   :  { %541 = vsyncpa [#allocation6], 1 }
 0x1a5   :  { %542 = vsyncpa [#allocation8], 1 }

</bundles_post_ra>
